<compile_context>
chip_gen: v5e
topology: v5e:2x2
jax: 0.10.0
libtpu: 0.0.40
codegen_flags: <defaults>
</compile_context>

<pallas_src>
import functools
import math

import numpy as np
import jax
import jax.numpy as jnp
from jax.experimental import pallas as pl
from jax.experimental.pallas import tpu as pltpu


# ----------------------------- config -----------------------------------
class Args:
    obs_shape = 16        # observation dim (also action output dim of fc2)
    time_dim = 8          # sinusoidal time embedding dim (even)
    hidden_size = 32      # time-MLP hidden
    rnn_hidden_dim = 32   # GRU hidden
    epsilon_ball = 1.0    # unused in forward


INPUT_SHAPE = 4           # x_n feature dim
BATCH = 2
SLAB_COLS = 128           # lane width of packed slabs
HIGH = jax.lax.Precision.HIGHEST


def _round_up(x, m):
    return ((x + m - 1) // m) * m


# ----------------------------- kernel ------------------------------------
def model_rnn_kernel(in_ref, w_ref, b_ref, out_ref, *, dims):
    half = dims["half"]; TD = dims["TD"]; HS = dims["HS"]; H = dims["H"]
    XO_PAD = dims["XO_PAD"]
    LXO = dims["lane_xo"]; LH = dims["lane_h"]
    f32 = jnp.float32
    B = in_ref.shape[0]

    # ---- unpack the (B, 128) input slab ----
    time = in_ref[:, 0:1]                           # (B, 1)
    xo = in_ref[:, LXO:LXO + XO_PAD]                # (B, XO_PAD)  [x_n | inputs | 0pad]
    h_prev = in_ref[:, LH:LH + H]                   # (B, H)

    # ---- SinusoidalPosEmb: duplicated freqs + lane select (no concat) ----
    freq = b_ref[5:6, 0:TD]                         # (1, TD) = [f0..f_{h-1} f0..f_{h-1}]
    arg = time * freq                               # (B, TD)
    lane = jax.lax.broadcasted_iota(jnp.int32, (B, TD), 1)
    emb = jnp.where(lane < half, jnp.sin(arg), jnp.cos(arg))

    # ---- time-MLP first layer ----
    r0 = dims["r_wt1"]
    h1 = jnp.maximum(
        jnp.dot(emb, w_ref[r0:r0 + TD, 0:HS], preferred_element_type=f32)
        + b_ref[0:1, 0:HS], 0.0)

    # ---- fc1 with time-MLP second linear folded in (self.mish == nn.ReLU) ----
    rxo = dims["r_w1xo"]; rte = dims["r_w1t"]
    x = jnp.dot(xo, w_ref[rxo:rxo + XO_PAD, 0:H], preferred_element_type=f32)
    x = x + jnp.dot(h1, w_ref[rte:rte + HS, 0:H], preferred_element_type=f32)
    x = jnp.maximum(x + b_ref[1:2, 0:H], 0.0)

    # ---- GRUCell, fused gate matmuls, gate order r, z, n (PyTorch) ----
    ri = dims["r_wih"]; rh = dims["r_whh"]
    # bias row 2 = [b_ir+b_hr | b_iz+b_hz | b_in]; b_hn added inside r*(...)
    gi = (jnp.dot(x, w_ref[ri:ri + H, 0:3 * H], preferred_element_type=f32)
          + b_ref[2:3, 0:3 * H])
    gh = jnp.dot(h_prev, w_ref[rh:rh + H, 0:3 * H], preferred_element_type=f32)
    rz = jax.nn.sigmoid(gi[:, 0:2 * H] + gh[:, 0:2 * H])     # fused r|z sigmoid
    r = rz[:, 0:H]
    z = rz[:, H:2 * H]
    n = jnp.tanh(gi[:, 2 * H:3 * H] + r * (gh[:, 2 * H:3 * H] + b_ref[3:4, 0:H]))
    h_new = (1.0 - z) * n + z * h_prev

    # ---- fc2 fused with identity pass-through of h: one lane-dense store ----
    # out lanes [0:OBS] = actions, [OBS:OBS+H] = h_new, rest = 0
    ro = dims["r_wout"]
    out_ref[...] = (jnp.dot(h_new, w_ref[ro:ro + H, :], preferred_element_type=f32)
                    + b_ref[4:5, :])


# ----------------------------- wrapper ------------------------------------
def model_rnn_forward(packed, x_n, time, inputs, hidden_state, args):
    w_slab, b_slab, dims = packed
    B = x_n.shape[0]
    H = args.rnn_hidden_dim
    OBS = args.obs_shape
    IN = x_n.shape[1]
    LXO = dims["lane_xo"]; LH = dims["lane_h"]

    h_in = hidden_state.reshape(-1, H).astype(jnp.float32)

    # single lane-dense (B, 128) activation slab: time | [x_n | inputs] | h_in
    in_slab = jnp.zeros((B, SLAB_COLS), jnp.float32)
    in_slab = in_slab.at[:, 0].set(time.astype(jnp.float32))
    in_slab = in_slab.at[:, LXO:LXO + IN + OBS].set(
        jnp.concatenate([x_n.astype(jnp.float32), inputs.astype(jnp.float32)], axis=-1))
    in_slab = in_slab.at[:, LH:LH + H].set(h_in)

    kernel = functools.partial(model_rnn_kernel, dims=dims)
    vmem = pl.BlockSpec(memory_space=pltpu.MemorySpace.VMEM)

    out = pl.pallas_call(
        kernel,
        out_shape=jax.ShapeDtypeStruct((B, SLAB_COLS), jnp.float32),
        in_specs=[vmem, vmem, vmem],
        out_specs=vmem,
    )(in_slab, w_slab, b_slab)

    return {"actions": out[:, 0:OBS], "hidden_state": out[:, OBS:OBS + H]}


# ----------------------------- param init ---------------------------------
def init_params(key, args):
    """PyTorch-style init; weights stored transposed as (in_features, out_features)."""
    H = args.rnn_hidden_dim
    TD = args.time_dim
    HS = args.hidden_size
    IN = INPUT_SHAPE
    OBS = args.obs_shape
    keys = iter(jax.random.split(key, 12))

    def linear(k, fan_in, fan_out):
        kw, kb = jax.random.split(k)
        bound = 1.0 / math.sqrt(fan_in)
        w = jax.random.uniform(kw, (fan_in, fan_out), jnp.float32, -bound, bound)
        b = jax.random.uniform(kb, (fan_out,), jnp.float32, -bound, bound)
        return w, b

    p = {}
    p["wt1"], p["bt1"] = linear(next(keys), TD, HS)
    p["wt2"], p["bt2"] = linear(next(keys), HS, TD)
    p["w1"], p["b1"] = linear(next(keys), IN + OBS + TD, H)

    # GRUCell(H, H): stored as (H, 3H); biases (3H,); gate order r, z, n.
    bound = 1.0 / math.sqrt(H)
    p["w_ih"] = jax.random.uniform(next(keys), (H, 3 * H), jnp.float32, -bound, bound)
    p["b_ih"] = jax.random.uniform(next(keys), (3 * H,), jnp.float32, -bound, bound)
    p["w_hh"] = jax.random.uniform(next(keys), (H, 3 * H), jnp.float32, -bound, bound)
    p["b_hh"] = jax.random.uniform(next(keys), (3 * H,), jnp.float32, -bound, bound)

    p["w2"], p["b2"] = linear(next(keys), H, OBS)
    return p


# ----------------------------- param packing -------------------------------
def pack_params(params, args):
    H = args.rnn_hidden_dim
    TD = args.time_dim
    HS = args.hidden_size
    IN = INPUT_SHAPE
    OBS = args.obs_shape
    half = TD // 2

    # w1 rows are ordered [x_n rows | t rows | inputs rows]
    w1 = params["w1"]
    w1_xn = w1[0:IN]
    w1_t = w1[IN:IN + TD]
    w1_obs = w1[IN + TD:IN + TD + OBS]

    # Fold time-MLP second linear into fc1 (t is never returned, zero accuracy cost).
    w1_t_eff = jnp.dot(params["wt2"], w1_t, precision=HIGH)              # (HS, H)
    b1_eff = params["b1"] + jnp.dot(params["bt2"], w1_t, precision=HIGH)  # (H,)
    w1_xo = jnp.concatenate([w1_xn, w1_obs], axis=0)                      # (IN+OBS, H)

    # fc2 fused with identity pass-through of h -> one lane-dense output dot.
    w_out = jnp.concatenate([params["w2"], jnp.eye(H, dtype=jnp.float32)], axis=1)
    b_out = jnp.concatenate([params["b2"], jnp.zeros((H,), jnp.float32)])

    # --- weight slab: each section stored (in, out), rows padded to x8 ---
    sections = [("wt1", params["wt1"]), ("w1_t_eff", w1_t_eff),
                ("w1_xo", w1_xo), ("w_ih", params["w_ih"]),
                ("w_hh", params["w_hh"]), ("w_out", w_out)]
    blocks, offsets, row = [], {}, 0
    for name, w in sections:
        n_r, n_c = w.shape
        pr = _round_up(n_r, 8)
        blk = jnp.zeros((pr, SLAB_COLS), jnp.float32).at[:n_r, :n_c].set(w)
        blocks.append(blk)
        offsets[name] = row
        row += pr
    w_slab = jnp.concatenate(blocks, axis=0)   # (160, 128) f32 = 80 KiB

    # --- bias slab (8, 128) ---
    b_slab = jnp.zeros((8, SLAB_COLS), jnp.float32)
    b_slab = b_slab.at[0, :HS].set(params["bt1"])
    b_slab = b_slab.at[1, :H].set(b1_eff)
    b_gru_i = jnp.concatenate([
        params["b_ih"][0:H] + params["b_hh"][0:H],           # r: b_ir + b_hr
        params["b_ih"][H:2 * H] + params["b_hh"][H:2 * H],   # z: b_iz + b_hz
        params["b_ih"][2 * H:3 * H],                         # n: b_in
    ])
    b_slab = b_slab.at[2, :3 * H].set(b_gru_i)
    b_slab = b_slab.at[3, :H].set(params["b_hh"][2 * H:3 * H])   # b_hn
    b_slab = b_slab.at[4, :OBS + H].set(b_out)
    scale = math.log(10000.0) / max(half - 1, 1)
    freqs = jnp.exp(jnp.arange(half, dtype=jnp.float32) * -scale)
    b_slab = b_slab.at[5, :TD].set(jnp.concatenate([freqs, freqs]))  # duplicated for sin|cos select

    xo_pad = _round_up(IN + OBS, 8)
    dims = dict(half=half, TD=TD, HS=HS, H=H, IN=IN, OBS=OBS, XO_PAD=xo_pad,
                lane_xo=8, lane_h=8 + xo_pad,
                r_wt1=offsets["wt1"], r_w1t=offsets["w1_t_eff"],
                r_w1xo=offsets["w1_xo"], r_wih=offsets["w_ih"],
                r_whh=offsets["w_hh"], r_wout=offsets["w_out"])
    return w_slab, b_slab, dims


# ----------------------------- pure-JAX reference --------------------------
def reference_forward(params, x_n, time, inputs, hidden_state, args):
    H = args.rnn_hidden_dim
    half = args.time_dim // 2
    scale = math.log(10000.0) / max(half - 1, 1)
    freqs = jnp.exp(jnp.arange(half, dtype=jnp.float32) * -scale)
    arg = time[:, None] * freqs[None, :]
    emb = jnp.concatenate([jnp.sin(arg), jnp.cos(arg)], axis=-1)
    h1 = jax.nn.relu(jnp.dot(emb, params["wt1"], precision=HIGH) + params["bt1"])
    t = jnp.dot(h1, params["wt2"], precision=HIGH) + params["bt2"]
    out = jnp.concatenate([x_n, t, inputs], axis=-1)
    x = jax.nn.relu(jnp.dot(out, params["w1"], precision=HIGH) + params["b1"])
    h_prev = hidden_state.reshape(-1, H)
    gi = jnp.dot(x, params["w_ih"], precision=HIGH) + params["b_ih"]
    gh = jnp.dot(h_prev, params["w_hh"], precision=HIGH) + params["b_hh"]
    r = jax.nn.sigmoid(gi[:, :H] + gh[:, :H])
    z = jax.nn.sigmoid(gi[:, H:2 * H] + gh[:, H:2 * H])
    n = jnp.tanh(gi[:, 2 * H:] + r * gh[:, 2 * H:])
    h = (1.0 - z) * n + z * h_prev
    actions = jnp.dot(h, params["w2"], precision=HIGH) + params["b2"]
    return actions, h


# ----------------------------- main ----------------------------------------
if __name__ == "__main__":
    args = Args()
    key = jax.random.PRNGKey(0)
    kp, kx, kt, ko, kh = jax.random.split(key, 5)

    params = init_params(kp, args)
    packed = pack_params(params, args)

    x_n = jax.random.normal(kx, (BATCH, INPUT_SHAPE), jnp.float32)
    time = jax.random.randint(kt, (BATCH,), 0, 100).astype(jnp.float32)
    inputs = jax.random.normal(ko, (BATCH, args.obs_shape), jnp.float32)
    hidden_state = jax.random.normal(kh, (BATCH, args.rnn_hidden_dim), jnp.float32)

    ref_actions, ref_h = reference_forward(params, x_n, time, inputs, hidden_state, args)
    ref_actions = jax.block_until_ready(ref_actions)
    ref_h = jax.block_until_ready(ref_h)

    out = model_rnn_forward(packed, x_n, time, inputs, hidden_state, args)
    jax.block_until_ready(out)

    np.testing.assert_allclose(np.asarray(out["actions"]), np.asarray(ref_actions),
                               rtol=1e-4, atol=1e-4)
    np.testing.assert_allclose(np.asarray(out["hidden_state"]), np.asarray(ref_h),
                               rtol=1e-4, atol=1e-4)

    print("KERNEL_OK")
</pallas_src>

<mosaic_0001>
module attributes {stable_mosaic.version = 11 : i64} {
  func.func @model_rnn_kernel(%arg0: memref<2x128xf32, #tpu.memory_space<vmem>>, %arg1: memref<160x128xf32, #tpu.memory_space<vmem>>, %arg2: memref<8x128xf32, #tpu.memory_space<vmem>>, %arg3: memref<2x128xf32, #tpu.memory_space<vmem>>) attributes {dimension_semantics = [], scalar_prefetch = 0 : i64, scratch_operands = 0 : i64, tpu.core_type = #tpu.core_type<tc>} {
    %c0 = arith.constant 0 : index
    %c0_0 = arith.constant 0 : index
    %0 = vector.load %arg0[%c0, %c0_0] : memref<2x128xf32, #tpu.memory_space<vmem>>, vector<2x1xf32>
    %c0_1 = arith.constant 0 : index
    %c8 = arith.constant 8 : index
    %1 = vector.load %arg0[%c0_1, %c8] : memref<2x128xf32, #tpu.memory_space<vmem>>, vector<2x24xf32>
    %c0_2 = arith.constant 0 : index
    %c32 = arith.constant 32 : index
    %2 = vector.load %arg0[%c0_2, %c32] : memref<2x128xf32, #tpu.memory_space<vmem>>, vector<2x32xf32>
    %c5 = arith.constant 5 : index
    %c0_3 = arith.constant 0 : index
    %3 = vector.load %arg2[%c5, %c0_3] : memref<8x128xf32, #tpu.memory_space<vmem>>, vector<1x8xf32>
    %4 = vector.broadcast %0 : vector<2x1xf32> to vector<2x8xf32>
    %5 = vector.broadcast %3 : vector<1x8xf32> to vector<2x8xf32>
    %6 = arith.mulf %4, %5 : vector<2x8xf32>
    %7 = tpu.iota {dimensions = array<i32: 1>} : vector<2x8xi32>
    %c4_i32 = arith.constant 4 : i32
    %8 = vector.broadcast %c4_i32 : i32 to vector<2x8xi32>
    %9 = arith.cmpi slt, %7, %8 : vector<2x8xi32>
    %10 = math.sin %6 : vector<2x8xf32>
    %11 = math.cos %6 : vector<2x8xf32>
    %12 = arith.select %9, %10, %11 : vector<2x8xi1>, vector<2x8xf32>
    %c0_4 = arith.constant 0 : index
    %c0_5 = arith.constant 0 : index
    %13 = vector.load %arg1[%c0_4, %c0_5] : memref<160x128xf32, #tpu.memory_space<vmem>>, vector<8x32xf32>
    %cst = arith.constant dense<0.000000e+00> : vector<2x32xf32>
    %14 = tpu.matmul %12, %13, %cst {dimension_numbers = #tpu.dot_dimension_numbers<[1], [0], [0], [1], [0, 0, 1, 1], [], []>} : vector<2x8xf32>, vector<8x32xf32>, vector<2x32xf32> -> vector<2x32xf32>
    %c0_6 = arith.constant 0 : index
    %c0_7 = arith.constant 0 : index
    %15 = vector.load %arg2[%c0_6, %c0_7] : memref<8x128xf32, #tpu.memory_space<vmem>>, vector<1x32xf32>
    %16 = vector.broadcast %15 : vector<1x32xf32> to vector<2x32xf32>
    %17 = arith.addf %14, %16 : vector<2x32xf32>
    %cst_8 = arith.constant 0.000000e+00 : f32
    %18 = vector.broadcast %cst_8 : f32 to vector<2x32xf32>
    %19 = arith.maximumf %17, %18 : vector<2x32xf32>
    %c40 = arith.constant 40 : index
    %c0_9 = arith.constant 0 : index
    %20 = vector.load %arg1[%c40, %c0_9] : memref<160x128xf32, #tpu.memory_space<vmem>>, vector<24x32xf32>
    %cst_10 = arith.constant dense<0.000000e+00> : vector<2x32xf32>
    %21 = tpu.matmul %1, %20, %cst_10 {dimension_numbers = #tpu.dot_dimension_numbers<[1], [0], [0], [1], [0, 0, 1, 1], [], []>} : vector<2x24xf32>, vector<24x32xf32>, vector<2x32xf32> -> vector<2x32xf32>
    %c8_11 = arith.constant 8 : index
    %c0_12 = arith.constant 0 : index
    %22 = vector.load %arg1[%c8_11, %c0_12] : memref<160x128xf32, #tpu.memory_space<vmem>>, vector<32x32xf32>
    %cst_13 = arith.constant dense<0.000000e+00> : vector<2x32xf32>
    %23 = tpu.matmul %19, %22, %cst_13 {dimension_numbers = #tpu.dot_dimension_numbers<[1], [0], [0], [1], [0, 0, 1, 1], [], []>} : vector<2x32xf32>, vector<32x32xf32>, vector<2x32xf32> -> vector<2x32xf32>
    %24 = arith.addf %21, %23 : vector<2x32xf32>
    %c1 = arith.constant 1 : index
    %c0_14 = arith.constant 0 : index
    %25 = vector.load %arg2[%c1, %c0_14] : memref<8x128xf32, #tpu.memory_space<vmem>>, vector<1x32xf32>
    %26 = vector.broadcast %25 : vector<1x32xf32> to vector<2x32xf32>
    %27 = arith.addf %24, %26 : vector<2x32xf32>
    %cst_15 = arith.constant 0.000000e+00 : f32
    %28 = vector.broadcast %cst_15 : f32 to vector<2x32xf32>
    %29 = arith.maximumf %27, %28 : vector<2x32xf32>
    %c64 = arith.constant 64 : index
    %c0_16 = arith.constant 0 : index
    %30 = vector.load %arg1[%c64, %c0_16] : memref<160x128xf32, #tpu.memory_space<vmem>>, vector<32x96xf32>
    %cst_17 = arith.constant dense<0.000000e+00> : vector<2x96xf32>
    %31 = tpu.matmul %29, %30, %cst_17 {dimension_numbers = #tpu.dot_dimension_numbers<[1], [0], [0], [1], [0, 0, 1, 1], [], []>} : vector<2x32xf32>, vector<32x96xf32>, vector<2x96xf32> -> vector<2x96xf32>
    %c2 = arith.constant 2 : index
    %c0_18 = arith.constant 0 : index
    %32 = vector.load %arg2[%c2, %c0_18] : memref<8x128xf32, #tpu.memory_space<vmem>>, vector<1x96xf32>
    %33 = vector.broadcast %32 : vector<1x96xf32> to vector<2x96xf32>
    %34 = arith.addf %31, %33 : vector<2x96xf32>
    %c96 = arith.constant 96 : index
    %c0_19 = arith.constant 0 : index
    %35 = vector.load %arg1[%c96, %c0_19] : memref<160x128xf32, #tpu.memory_space<vmem>>, vector<32x96xf32>
    %cst_20 = arith.constant dense<0.000000e+00> : vector<2x96xf32>
    %36 = tpu.matmul %2, %35, %cst_20 {dimension_numbers = #tpu.dot_dimension_numbers<[1], [0], [0], [1], [0, 0, 1, 1], [], []>} : vector<2x32xf32>, vector<32x96xf32>, vector<2x96xf32> -> vector<2x96xf32>
    %37 = vector.extract_strided_slice %34 {offsets = [0, 0], sizes = [2, 64], strides = [1, 1]} : vector<2x96xf32> to vector<2x64xf32>
    %38 = vector.extract_strided_slice %36 {offsets = [0, 0], sizes = [2, 64], strides = [1, 1]} : vector<2x96xf32> to vector<2x64xf32>
    %39 = arith.addf %37, %38 : vector<2x64xf32>
    %40 = arith.negf %39 : vector<2x64xf32>
    %41 = math.exp %40 : vector<2x64xf32>
    %cst_21 = arith.constant 1.000000e+00 : f32
    %42 = vector.broadcast %cst_21 : f32 to vector<2x64xf32>
    %43 = arith.addf %42, %41 : vector<2x64xf32>
    %44 = arith.divf %42, %43 : vector<2x64xf32>
    %45 = vector.extract_strided_slice %44 {offsets = [0, 0], sizes = [2, 32], strides = [1, 1]} : vector<2x64xf32> to vector<2x32xf32>
    %46 = vector.extract_strided_slice %44 {offsets = [0, 32], sizes = [2, 32], strides = [1, 1]} : vector<2x64xf32> to vector<2x32xf32>
    %47 = vector.extract_strided_slice %34 {offsets = [0, 64], sizes = [2, 32], strides = [1, 1]} : vector<2x96xf32> to vector<2x32xf32>
    %48 = vector.extract_strided_slice %36 {offsets = [0, 64], sizes = [2, 32], strides = [1, 1]} : vector<2x96xf32> to vector<2x32xf32>
    %c3 = arith.constant 3 : index
    %c0_22 = arith.constant 0 : index
    %49 = vector.load %arg2[%c3, %c0_22] : memref<8x128xf32, #tpu.memory_space<vmem>>, vector<1x32xf32>
    %50 = vector.broadcast %49 : vector<1x32xf32> to vector<2x32xf32>
    %51 = arith.addf %48, %50 : vector<2x32xf32>
    %52 = arith.mulf %45, %51 : vector<2x32xf32>
    %53 = arith.addf %47, %52 : vector<2x32xf32>
    %54 = math.tanh %53 : vector<2x32xf32>
    %cst_23 = arith.constant 1.000000e+00 : f32
    %55 = vector.broadcast %cst_23 : f32 to vector<2x32xf32>
    %56 = arith.subf %55, %46 : vector<2x32xf32>
    %57 = arith.mulf %56, %54 : vector<2x32xf32>
    %58 = arith.mulf %46, %2 : vector<2x32xf32>
    %59 = arith.addf %57, %58 : vector<2x32xf32>
    %c128 = arith.constant 128 : index
    %c0_24 = arith.constant 0 : index
    %60 = vector.load %arg1[%c128, %c0_24] : memref<160x128xf32, #tpu.memory_space<vmem>>, vector<32x128xf32>
    %cst_25 = arith.constant dense<0.000000e+00> : vector<2x128xf32>
    %61 = tpu.matmul %59, %60, %cst_25 {dimension_numbers = #tpu.dot_dimension_numbers<[1], [0], [0], [1], [0, 0, 1, 1], [], []>} : vector<2x32xf32>, vector<32x128xf32>, vector<2x128xf32> -> vector<2x128xf32>
    %c4 = arith.constant 4 : index
    %c0_26 = arith.constant 0 : index
    %62 = vector.load %arg2[%c4, %c0_26] : memref<8x128xf32, #tpu.memory_space<vmem>>, vector<1x128xf32>
    %63 = vector.broadcast %62 : vector<1x128xf32> to vector<2x128xf32>
    %64 = arith.addf %61, %63 : vector<2x128xf32>
    %c0_27 = arith.constant 0 : index
    %c0_28 = arith.constant 0 : index
    %65 = vector.load %arg3[%c0_27, %c0_28] : memref<2x128xf32, #tpu.memory_space<vmem>>, vector<2x128xf32>
    tpu.vector_store %arg3[%c0_27, %c0_28], %64 {strides = array<i32>} : memref<2x128xf32, #tpu.memory_space<vmem>>, vector<2x128xf32>,
    return
  }
}

</mosaic_0001>

<bundles_post_ra>
// kernel: tpu_custom_call.1
= control target key start
LH: loop header
LB: loop body
LE: loop exit
PB: predicated region body
PF: predicated region fallthrough
CT: control target
= control target key end

     0   :  { %8 = vsyncpa [#allocation3], 0  ;;  %s891_s0 = inlined_call_operand.hbm [shape: f32[2,128], index: 0, kind: input, shape index: {}]   ;;  %s892_s1 = inlined_call_operand.hbm [shape: f32[160,128], index: 1, kind: input, shape index: {}]   ;;  %s893_s2 = inlined_call_operand.hbm [shape: f32[8,128], index: 2, kind: input, shape index: {}]   ;;  %s894_s3 = inlined_call_operand.hbm [shape: f32[2,128], index: 3, kind: output, shape index: {}]  }
   0x1   :  { %9 = vsyncpa [#allocation6], 0  ;;  %s26_s14 = sshll.u32 %s892_s1, 4  ;;  %s27_s14 = int_to_ptr.hbm [resolvable:$true] %s26_s14 }
   0x2   :  { %10 = vsyncpa [#allocation4], 0  ;;  %s765_s15 = smov [#allocation5]   ;;  %s16_s19 = sshll.u32 %s891_s0, 4  ;;  %s17_s19 = int_to_ptr.hbm [resolvable:$true] %s16_s19 }
   0x3   :  { %s28_s16 = sshll.u32 %s765_s15, 4  ;;  %s766_s20 = smov 128   ;;  %s29_s16 = int_to_ptr.vmem [resolvable:$true] %s28_s16 }
   0x4   :  { %s767_s21 = smov 8   ;;  %s768_s22 = smov [#allocation2]  }
   0x5   :  { %34 = dma.hbm_to_vmem [thread:$0]  %s27_s14, 2560, %s29_s16, [#allocation6], %s766_s20, %s766_s20, %s767_s21  }
   0x6   :  { %s18_s23 = sshll.u32 %s768_s22, 4  ;;  %s40_s26 = sshll.u32 %s893_s2, 4  ;;  %s19_s23 = int_to_ptr.vmem [resolvable:$true] %s18_s23  ;;  %s41_s26 = int_to_ptr.hbm [resolvable:$true] %s40_s26 }
   0x7   :  { %21 = dma.hbm_to_vmem [thread:$0]  %s17_s19, 32, %s19_s23, [#allocation3]  }
   0x8   :  { %s769_s1 = smov [#allocation7]  }
   0x9   :  { %s42_s27 = sshll.u32 %s769_s1, 4  ;;  %s43_s27 = int_to_ptr.vmem [resolvable:$true] %s42_s27 }
   0xa   :  { %45 = dma.hbm_to_vmem [thread:$0]  %s41_s26, 128, %s43_s27, [#allocation6]  }
   0xb   :  { %759 = dma.done.wait [#allocation3], 32  }
   0xc   :  { %760 = vsyncadd [#allocation3], 4294967264 }
   0xd   :  { %761 = dma.done.wait [#allocation6], 2688  }
   0xe   :  { %762 = vsyncadd [#allocation6], 4294964608  ;;  %v770_v0 = vmov 0   ;;  %v811_v1 = vld [vmem:[#allocation2] sm:$0x3]  ;;  %s771_s0 = smov 120  }
   0xf   :  { %650 = vset.pattern.permute.xlu0 %v770_v0  ;;  %s772_s2 = smov 96   ;;  %v651_v2 = vld [vmem:[#allocation7 + $0x5] ss:$0 sm:$0xff]  ;;  %v773_v17 = vmov 683565275   ;;  %vm441_vm14 = vcmask 195584  }
  0x10   :  { %62 = vperm.xlu0 %650, %v811_v1   ;;  %501 = vrot.lane.b32.xlu1 %v811_v1, %s772_s2  ;;  %v380_v5 = vld [vmem:[#allocation5] sm:$0xff]  ;;  %v774_v19 = vmov 2475754826   ;;  %v775_v22 = vmov 2131351028   ;;  %s779_s28 = smov 64  }
  0x11   :  { %402 = vmatpush.msra.mxu0 %v380_v5  ;;  %v776_v25 = vmov 2102212464   ;;  %v777_v28 = vmov 920167782   ;;  %v778_v31 = vmov 1326507024  }
  0x12   :  { %s780_s29 = smov [#allocation8]   ;;  %s610_s6 = sshll.u32 %s894_s3, 4  ;;  %s611_s6 = int_to_ptr.hbm [resolvable:$true] %s610_s6 }
  0x13   :  { %s608_s30 = sshll.u32 %s780_s29, 4  ;;  %s609_s30 = int_to_ptr.vmem [resolvable:$true] %s608_s30 }
  0x18   :  { %439 = vrot.lane.b32.xlu0 %v811_v1, %s771_s0 }
  0x82   :  { %v63_v3 = vpop.permute.xlu0 %62 }
  0x83   :  { %v817_v4 = vmul.f32 %v651_v2, %v63_v3 }
  0x85   :  { %v73_v6 = vand.u32 2139095040, %v817_v4  ;;  %v70_v9 = vand.u32 2147483647, %v817_v4  ;;  %vm72_vm12 = vcmp.lt.s32.totalorder %v817_v4, 0 }
  0x87   :  { %v74_v7 = vshrl.u32 %v73_v6, 23  ;;  %v77_v11 = vand.u32 8388607, %v70_v9  ;;  %vm71_vm13 = vcmp.le.f32.partialorder %v70_v9, 0.7853982 }
  0x89   :  { %v621_v8 = vadd.s32 4294967169, %v74_v7  ;;  %v78_v15 = vor.u32 8388608, %v77_v11 }
  0x8b   :  { %v80_v10 = vadd.s32 1, %v621_v8  ;;  %v834_v38 = vshll.u32 %v78_v15, 8 }
  0x8d   :  { %vm81_vm0 = vcmp.gt.s32.totalorder %v80_v10, 0  ;;  %v119_v47 = vand.u32 65535, %v834_v38  ;;  %v120_v48 = vshrl.u32 %v834_v38, 16 }
  0x8e   :  { %v82_v12 = vsel %vm81_vm0, %v80_v10, 0 }
  0x8f   :  { %v84_v13 = vand.u32 31, %v82_v12  ;;  %v825_v16 = vshrl.u32 %v82_v12, 5 }
  0x91   :  { %v823_v14 = vsub.s32 32, %v84_v13  ;;  %v87_v18 = vshll.u32 %v773_v17, %v84_v13  ;;  %v90_v20 = vshll.u32 %v774_v19, %v84_v13  ;;  %v93_v24 = vshll.u32 %v775_v22, %v84_v13 }
  0x92   :  { %v96_v27 = vshll.u32 %v776_v25, %v84_v13  ;;  %v99_v30 = vshll.u32 %v777_v28, %v84_v13  ;;  %vm102_vm1 = vcmp.lt.s32.totalorder %v825_v16, 1  ;;  %vm105_vm2 = vcmp.lt.s32.totalorder %v825_v16, 4 }
  0x93   :  { %v88_v21 = vshrl.u32 %v774_v19, %v823_v14  ;;  %v91_v23 = vshrl.u32 %v775_v22, %v823_v14  ;;  %v94_v26 = vshrl.u32 %v776_v25, %v823_v14  ;;  %v97_v29 = vshrl.u32 %v777_v28, %v823_v14 }
  0x94   :  { %v100_v32 = vshrl.u32 %v778_v31, %v823_v14  ;;  %vm104_vm3 = vcmp.lt.s32.totalorder %v825_v16, 3  ;;  %vm103_vm4 = vcmp.lt.s32.totalorder %v825_v16, 2  ;;  %v86_v13 = vshrl.u32 %v773_v17, %v823_v14 }
  0x95   :  { %v89_v33 = vor.u32 %v88_v21, %v87_v18  ;;  %v92_v34 = vor.u32 %v91_v23, %v90_v20  ;;  %v95_v35 = vor.u32 %v94_v26, %v93_v24  ;;  %v98_v36 = vor.u32 %v97_v29, %v96_v27 }
  0x96   :  { %v101_v37 = vor.u32 %v100_v32, %v99_v30 }
  0x97   :  { %v110_v39 = vsel %vm102_vm1, %v89_v33, %v92_v34  ;;  %v114_v40 = vsel %vm102_vm1, %v92_v34, %v95_v35  ;;  %v111_v41 = vsel %vm105_vm2, %v98_v36, 920167782  ;;  %v107_v10 = vsel %vm105_vm2, %v95_v35, 2102212464 }
  0x98   :  { %v115_v42 = vsel %vm105_vm2, %v101_v37, 1326507024  ;;  %v112_v43 = vsel %vm104_vm3, %v95_v35, %v111_v41  ;;  %v106_v22 = vsel %vm102_vm1, %v86_v13, %v89_v33  ;;  %v108_v23 = vsel %vm104_vm3, %v92_v34, %v107_v10 }
  0x99   :  { %v116_v44 = vsel %vm104_vm3, %v98_v36, %v115_v42  ;;  %v113_v45 = vsel %vm103_vm4, %v110_v39, %v112_v43  ;;  %v109_v14 = vsel %vm103_vm4, %v106_v22, %v108_v23  ;;  %v67_v10 = vlaneseq }
  0x9a   :  { %v117_v46 = vsel %vm103_vm4, %v114_v40, %v116_v44  ;;  %v143_v51 = vand.u32 65535, %v113_v45  ;;  %v144_v52 = vshrl.u32 %v113_v45, 16  ;;  %v163_v30 = vmul.u32 %v834_v38, %v109_v14 }
  0x9b   :  { %v121_v49 = vand.u32 65535, %v117_v46  ;;  %v122_v50 = vshrl.u32 %v117_v46, 16 }
  0x9c   :  { %v146_v55 = vmul.u32 %v144_v52, %v119_v47  ;;  %v147_v56 = vmul.u32 %v143_v51, %v120_v48  ;;  %v145_v60 = vmul.u32 %v143_v51, %v119_v47  ;;  %v148_v2 = vmul.u32 %v144_v52, %v120_v48  ;;  %v409_v51 = vld [vmem:[#allocation5 + $0x30] sm:$0xff]  ;;  %v414_v52 = vld [vmem:[#allocation5 + $0x20] sm:$0xff] }
  0x9d   :  { %v124_v53 = vmul.u32 %v122_v50, %v119_v47  ;;  %v125_v54 = vmul.u32 %v121_v49, %v120_v48  ;;  %v123_v57 = vmul.u32 %v121_v49, %v119_v47  ;;  %v126_v59 = vmul.u32 %v122_v50, %v120_v48  ;;  %v410_v50 = vld [vmem:[#allocation5 + $0x38] sm:$0xff]  ;;  %431 = vmatpush.msra.mxu1 %v414_v52  ;;  %v654_v52 = vld [vmem:[#allocation7 + $0x1] ss:$0 sm:$0xff] }
  0x9e   :  { %v149_v61 = vshll.u32 %v146_v55, 16  ;;  %v151_v5 = vshll.u32 %v147_v56, 16  ;;  %v150_v20 = vshrl.u32 %v146_v55, 16  ;;  %v152_v26 = vshrl.u32 %v147_v56, 16  ;;  %457 = vmatpush.msra.mxu2 %v410_v50  ;;  %v408_v55 = vld [vmem:[#allocation5 + $0x28] sm:$0xff] }
  0x9f   :  { %v127_v58 = vshll.u32 %v124_v53, 16  ;;  %v129_v62 = vshll.u32 %v125_v54, 16  ;;  %v128_v15 = vshrl.u32 %v124_v53, 16  ;;  %v130_v24 = vshrl.u32 %v125_v54, 16 }
  0xa0   :  { %vm153_vm6 = vc.u32 %v145_v60, %v149_v61  ;;  %v155_v6 = vadd.s32 %v149_v61, %v145_v60  ;;  %458 = vmatpush.msra.mxu2 %v409_v51 }
  0xa1   :  { %vm131_vm5 = vc.u32 %v123_v57, %v127_v58  ;;  %v133_v63 = vadd.s32 %v127_v58, %v123_v57  ;;  %v154_v8 = vsel %vm153_vm6, 1, %v770_v0  ;;  %vm213_vm6 = vweird.f32 %v817_v4 }
  0xa2   :  { %v132_v3 = vsel %vm131_vm5, 1, %v770_v0  ;;  %v156_v12 = vadd.s32 %v154_v8, %v148_v2  ;;  %vm157_vm8 = vc.u32 %v155_v6, %v151_v5  ;;  %v159_v29 = vadd.s32 %v155_v6, %v151_v5  ;;  %459 = vmatpush.msra.mxu2 %v408_v55 }
  0xa3   :  { %v134_v7 = vadd.s32 %v132_v3, %v126_v59  ;;  %vm135_vm7 = vc.u32 %v133_v63, %v129_v62  ;;  %v158_v19 = vsel %vm157_vm8, 1, %v770_v0  ;;  %vm415_vm8 = vcmask 261120  }
  0xa4   :  { %v136_v11 = vsel %vm135_vm7, 1, %v770_v0  ;;  %v160_v21 = vadd.s32 %v158_v19, %v156_v12  ;;  %v68_v19 = vand.u32 127, %v67_v10  ;;  %vm383_vm7 = vcmask 64512  }
  0xa5   :  { %v138_v18 = vadd.s32 %v136_v11, %v134_v7 }
  0xa6   :  { %v161_v27 = vadd.s32 %v160_v21, %v150_v20  ;;  %vm69_vm15 = vcmp.lt.s32.totalorder %v68_v19, 4 }
  0xa7   :  { %v139_v25 = vadd.s32 %v138_v18, %v128_v15  ;;  %v440_v15 = vpop.permute.xlu0 %439 }
  0xa8   :  { %v162_v17 = vadd.s32 %v161_v27, %v152_v26  ;;  %629 = vmatmul.msk.f32.vlgmr.msra.gmra.mxu2 %vm441_vm14, %v440_v15 }
  0xa9   :  { %v140_v28 = vadd.s32 %v139_v25, %v130_v24 }
  0xaa   :  { %v166_v0 = vadd.s32 1, %v162_v17 }
  0xab   :  { %vm165_vm9 = vc.u32 %v140_v28, %v159_v29  ;;  %v164_v16 = vadd.s32 %v159_v29, %v140_v28 }
  0xac   :  { %v167_v31 = vsel %vm165_vm9, %v166_v0, %v162_v17 }
  0xad   :  { %v168_v32 = vadd.s32 %v167_v31, %v163_v30 }
  0xaf   :  { %v169_v33 = vadd.s32 536870912, %v168_v32 }
  0xb1   :  { %v170_v35 = vshrl.u32 %v169_v33, 30  ;;  %v413_v33 = vld [vmem:[#allocation5 + $0x18] sm:$0xff] }
  0xb2   :  { %432 = vmatpush.msra.mxu1 %v413_v33 }
  0xb3   :  { %v171_v36 = vshll.u32 %v170_v35, 30  ;;  %v194_v59 = vsub.s32 4, %v170_v35 }
  0xb5   :  { %v172_v34 = vsub.s32 %v168_v32, %v171_v36  ;;  %v195_v2 = vsel %vm72_vm12, %v194_v59, %v170_v35  ;;  %v412_v35 = vld [vmem:[#allocation5 + $0x10] sm:$0xff]  ;;  %v411_v36 = vld [vmem:[#allocation5 + $0x8] sm:$0xff] }
  0xb6   :  { %v197_v6 = vsel %vm71_vm13, 0, %v195_v2  ;;  %433 = vmatpush.msra.mxu1 %v412_v35 }
  0xb7   :  { %vm173_vm10 = vcmp.lt.s32.totalorder %v172_v34, 0  ;;  %v174_v37 = vsub.s32 0, %v172_v34  ;;  %v214_v13 = vadd.s32 3, %v197_v6  ;;  %v369_v22 = vand.u32 3, %v197_v6 }
  0xb8   :  { %434 = vmatpush.msra.mxu1 %v411_v36 }
  0xb9   :  { %v175_v39 = vsel %vm173_vm10, %v174_v37, %v172_v34  ;;  %v215_v23 = vand.u32 3, %v214_v13  ;;  %vm370_vm0 = vcmp.lt.s32.totalorder %v369_v22, 2  ;;  %vm371_vm1 = vcmp.eq.s32.totalorder %v369_v22, 0  ;;  %v499_v37 = vld [vmem:[#allocation5 + $0x70] sm:$0xff] }
  0xba   :  { %v176_v40 = vclz %v175_v39  ;;  %vm374_vm5 = vcmp.eq.s32.totalorder %v369_v22, 2  ;;  %v653_v39 = vld [vmem:[#allocation7 + $0x3] ss:$0 sm:$0xff]  ;;  %v573_v22 = vld [vmem:[#allocation5 + $0x90] sm:$0xff] }
  0xbb   :  { %vm216_vm2 = vcmp.lt.s32.totalorder %v215_v23, 2  ;;  %vm217_vm3 = vcmp.eq.s32.totalorder %v215_v23, 0  ;;  %vm220_vm4 = vcmp.eq.s32.totalorder %v215_v23, 2  ;;  %548 = vrot.lane.b32.xlu1 %v653_v39, %s779_s28  ;;  %v572_v23 = vld [vmem:[#allocation5 + $0x88] sm:$0xff] }
  0xbc   :  { %v622_v41 = vadd.s32 4294967294, %v176_v40  ;;  %v498_v40 = vld [vmem:[#allocation5 + $0x68] sm:$0xff] }
  0xbe   :  { %vm623_vm11 = vcmp.lt.s32.totalorder %v622_v41, 0 }
  0xbf   :  { %v179_v42 = vsel %vm623_vm11, 0, %v622_v41  ;;  %v502_v41 = vpop.permute.xlu1 %501 }
  0xc0   :  { %v180_v43 = vsub.s32 32, %v179_v42  ;;  %v184_v44 = vsub.s32 4294967266, %v179_v42  ;;  %v181_v45 = vshll.u32 %v172_v34, %v179_v42  ;;  %v500_v34 = vld [vmem:[#allocation5 + $0x78] sm:$0xff]  ;;  %v652_v42 = vld [vmem:[#allocation7] ss:$0 sm:$0xff] }
  0xc1   :  { %517 = vmatpush.msrb.mxu0 %v500_v34 }
  0xc2   :  { %v182_v46 = vshrl.u32 %v164_v16, %v180_v43  ;;  %v185_v47 = vadd.s32 127, %v184_v44 }
  0xc3   :  { %518 = vmatpush.msrb.mxu0 %v499_v37 }
  0xc4   :  { %v183_v38 = vor.u32 %v182_v46, %v181_v45  ;;  %v186_v48 = vshll.u32 %v185_v47, 23  ;;  %v471_v45 = vld [vmem:[#allocation5 + $0x58] sm:$0xff]  ;;  %v470_v46 = vld [vmem:[#allocation5 + $0x50] sm:$0xff]  ;;  %v469_v47 = vld [vmem:[#allocation5 + $0x48] sm:$0xff] }
  0xc5   :  { %519 = vmatpush.msrb.mxu0 %v498_v40  ;;  %489 = vmatpush.msra.mxu3 %v471_v45 }
  0xc6   :  { %v187_v49 = vor.u32 4788187, %v186_v48  ;;  %v190_v54 = vcvt.s32.f32 %v183_v38  ;;  %v468_v38 = vld [vmem:[#allocation5 + $0x40] sm:$0xff] }
  0xc7   :  { %490 = vmatpush.msra.mxu3 %v470_v46 }
  0xc8   :  { %v188_v53 = vand.u32 2147483647, %v187_v49 }
  0xc9   :  { %491 = vmatpush.msra.mxu3 %v469_v47 }
  0xca   :  { %v191_v56 = vmul.f32 %v190_v54, %v188_v53 }
  0xcb   :  { %492 = vmatpush.msra.mxu3 %v468_v38 }
  0xcc   :  { %v192_v57 = vxor.u32 2147483648, %v191_v56 }
  0xce   :  { %v193_v58 = vsel %vm72_vm12, %v192_v57, %v191_v56  ;;  %v655_v57 = vld [vmem:[#allocation7 + $0x2] ss:$0 sm:$0xff] }
  0xcf   :  { %v196_v60 = vsel %vm71_vm13, %v817_v4, %v193_v58  ;;  %v497_v4 = vld [vmem:[#allocation5 + $0x60] sm:$0xff] }
  0xd0   :  { %v198_v61 = vmul.f32 %v196_v60, %v196_v60  ;;  %520 = vmatpush.msrb.mxu0 %v497_v4 }
  0xd2   :  { %v199_v62 = vmul.f32 -0.001358992, %v198_v61  ;;  %v206_v63 = vmul.f32 -0.00019511016, %v198_v61 }
  0xd4   :  { %v200_v3 = vadd.f32 0.041655596, %v199_v62  ;;  %v207_v5 = vadd.f32 0.008332121, %v206_v63 }
  0xd6   :  { %v201_v7 = vmul.f32 %v200_v3, %v198_v61  ;;  %v208_v8 = vmul.f32 %v207_v5, %v198_v61 }
  0xd8   :  { %v202_v11 = vadd.f32 -0.4999988, %v201_v7  ;;  %v209_v12 = vadd.f32 -0.16666654, %v208_v8 }
  0xda   :  { %v203_v9 = vmul.f32 %v202_v11, %v198_v61  ;;  %v210_v18 = vmul.f32 %v209_v12, %v198_v61 }
  0xdc   :  { %v204_v20 = vadd.f32 1.0, %v203_v9  ;;  %v211_v21 = vadd.f32 1.0, %v210_v18 }
  0xde   :  { %v212_v24 = vmul.f32 %v211_v21, %v196_v60  ;;  %v221_v25 = vxor.u32 2147483648, %v204_v20  ;;  %v574_v21 = vld [vmem:[#allocation5 + $0x98] sm:$0xff] }
  0xdf   :  { %594 = vmatpush.msrb.mxu2 %v574_v21 }
  0xe0   :  { %v218_v26 = vxor.u32 2147483648, %v212_v24  ;;  %v222_v28 = vsel %vm220_vm4, %v221_v25, %v212_v24  ;;  %v376_v14 = vsel %vm374_vm5, %v221_v25, %v212_v24  ;;  %v571_v24 = vld [vmem:[#allocation5 + $0x80] sm:$0xff] }
  0xe1   :  { %595 = vmatpush.msrb.mxu2 %v573_v22 }
  0xe2   :  { %v219_v27 = vsel %vm217_vm3, %v204_v20, %v218_v26  ;;  %v373_v29 = vsel %vm371_vm1, %v204_v20, %v218_v26 }
  0xe3   :  { %v223_v17 = vsel %vm216_vm2, %v219_v27, %v222_v28  ;;  %v377_v0 = vsel %vm370_vm0, %v373_v29, %v376_v14  ;;  %596 = vmatpush.msrb.mxu2 %v572_v23 }
  0xe4   :  { %v224_v30 = vsel %vm213_vm6, nan, %v223_v17  ;;  %v378_v31 = vsel %vm213_vm6, nan, %v377_v0  ;;  %v656_v17 = vld [vmem:[#allocation7 + $0x4] ss:$0 sm:$0xff] }
  0xe5   :  { %v379_v32 = vsel %vm69_vm15, %v224_v30, %v378_v31  ;;  %597 = vmatpush.msrb.mxu2 %v571_v24 }
  0xe6   :  { %627 = vmatmul.msk.f32.vlgmr.msra.gmra.mxu0 %vm383_vm7, %v379_v32 }
  0xee   :  { %631 = vmatmul.msk.f32.vlgmr.msrb.gmra.mxu0 %vm415_vm8, %v502_v41 }
 0x12b   :  { %v461_v51 = vpop.f32.mrf.mxu2 }
 0x12d   :  { %v549_v48 = vpop.permute.xlu1 %548 }
 0x163   :  { %v404_v16 = vpop.f32.mrf.mxu0 }
 0x164   :  { %v405_v43 = vadd.f32 %v652_v42, %v404_v16 }
 0x166   :  { %v407_v44 = vmax.f32 %v405_v43, 0.0 }
 0x168   :  { %628 = vmatmul.msk.f32.vlgmr.msra.gmra.mxu1 %vm415_vm8, %v407_v44 }
 0x16b   :  { %v522_v49 = vpop.f32.mrf.mxu0 }
 0x16c   :  { %v551_v50 = vadd.f32 %v549_v48, %v522_v49 }
 0x16e   :  { %553 = vrot.lane.b32.xlu2 %v551_v50, %s779_s28 }
 0x1c8   :  { %v554_v11 = vpop.permute.xlu2 %553 }
 0x1e5   :  { %v436_v53 = vpop.f32.mrf.mxu1 }
 0x1e6   :  { %v462_v54 = vadd.f32 %v461_v51, %v436_v53 }
 0x1e8   :  { %v466_v55 = vadd.f32 %v654_v52, %v462_v54 }
 0x1ea   :  { %v467_v56 = vmax.f32 %v466_v55, 0.0 }
 0x1ec   :  { %630 = vmatmul.msk.f32.vlgmr.msra.gmra.mxu3 %vm415_vm8, %v467_v56 }
 0x26f   :  { %v494_v58 = vpop.f32.mrf.mxu3 }
 0x270   :  { %v495_v59 = vadd.f32 %v655_v57, %v494_v58 }
 0x272   :  { %v525_v60 = vadd.f32 %v522_v49, %v495_v59 }
 0x274   :  { %v632_v61 = vmul.f32 -1.442695, %v525_v60 }
 0x276   :  { %657 = vpow2.f32 %v632_v61 }
 0x27c   :  { %v658_v62 = vpop.eup %657 }
 0x27d   :  { %v529_v63 = vadd.f32 1.0, %v658_v62 }
 0x27f   :  { %659 = vrcp.f32 %v529_v63  ;;  %v541_v6 = vand.u32 2147483648, %v529_v63  ;;  %v539_v8 = vand.u32 2147483647, %v529_v63  ;;  %vm535_vm10 = vweird.f32 %v529_v63 }
 0x281   :  { %v542_v12 = vor.u32 1.1754944e-38, %v541_v6  ;;  %vm540_vm12 = vcmp.eq.f32.partialorder %v539_v8, 8.507059e+37 }
 0x285   :  { %v660_v2 = vpop.eup %659 }
 0x286   :  { %v531_v3 = vmul.f32 %v660_v2, %v529_v63  ;;  %vm536_vm9 = vweird.f32 %v660_v2 }
 0x287   :  { %vm537_vm11 = vmor %vm535_vm10, %vm536_vm9 }
 0x288   :  { %v532_v5 = vsub.f32 1.0, %v531_v3 }
 0x28a   :  { %v533_v7 = vmul.f32 %v660_v2, %v532_v5 }
 0x28c   :  { %v534_v10 = vadd.f32 %v660_v2, %v533_v7 }
 0x28e   :  { %v538_v13 = vsel %vm537_vm11, %v660_v2, %v534_v10 }
 0x28f   :  { %v543_v15 = vsel %vm540_vm12, %v542_v12, %v538_v13 }
 0x290   :  { %v556_v9 = vmul.f32 %v554_v11, %v543_v15  ;;  %v563_v25 = vsub.f32 1.0, %v543_v15  ;;  %v569_v27 = vmul.f32 %v543_v15, %v811_v1 }
 0x292   :  { %558 = vrot.lane.b32.xlu2 %v556_v9, %s779_s28 }
 0x2ec   :  { %v559_v18 = vpop.permute.xlu2 %558 }
 0x2ed   :  { %v561_v19 = vadd.f32 %v559_v18, %v495_v59 }
 0x2ef   :  { %661 = vtanh.f32 %v561_v19 }
 0x2f5   :  { %v662_v20 = vpop.eup %661 }
 0x2f6   :  { %565 = vrot.lane.b32.xlu0 %v662_v20, %s772_s2 }
 0x368   :  { %v566_v26 = vpop.permute.xlu0 %565 }
 0x369   :  { %v568_v28 = vmul.f32 %v566_v26, %v563_v25 }
 0x36b   :  { %v570_v29 = vadd.f32 %v569_v27, %v568_v28 }
 0x36d   :  { %578 = vrot.lane.b32.xlu1 %v570_v29, %s772_s2 }
 0x3df   :  { %v579_v14 = vpop.permute.xlu1 %578 }
 0x3e0   :  { %633 = vmatmul.msk.f32.vlgmr.msrb.gmra.mxu2 %vm415_vm8, %v579_v14 }
 0x463   :  { %v599_v0 = vpop.f32.mrf.mxu2 }
 0x464   :  { %v600_v30 = vadd.f32 %v656_v17, %v599_v0 }
 0x466   :  { %602 = vst [vmem:[#allocation8] sm:$0x3] %v600_v30 }
 0x467   :  { %613 = dma.vmem_to_hbm [thread:$0]  %s609_s30, 32, %s611_s6, [#allocation4]  }
 0x468   :  { %763 = dma.done.wait [#allocation4], 32  }
 0x469   :  { %764 = vsyncadd [#allocation4], 4294967264 }
 0x46a   :  { %618 = vsyncpa [#allocation3], 1 }
 0x46b   :  { %619 = vsyncpa [#allocation6], 1 }
 0x46c   :  { %620 = vsyncpa [#allocation4], 1 }

</bundles_post_ra>
